<compile_context>
chip_gen: v7x
topology: tpu7x:2x2x1
jax: 0.10.0
libtpu: 0.0.40
codegen_flags: <defaults>
</compile_context>

<pallas_src>
import jax
import jax.numpy as jnp
from jax import lax
from jax.experimental import pallas as pl
from jax.experimental.pallas import tpu as pltpu


# ----------------------------- Pallas kernel ------------------------------- #

def _attention_fused_kernel(maps_ref, w1_ref, s1_ref, b1_ref,
                            w2_ref, s2_ref, b2_ref, o_ref, pad_ref):
    # maps_ref : (1, H, W*C2) f32   concat(x0, x1), channels flattened to lanes
    # w1_ref   : (L, 3*W*C2, W*C2) bf16   banded conv weights (hidden layers)
    # s1_ref   : (L, 1, W*C2) f32         folded BN scale, tiled along W
    # b1_ref   : (L, 1, W*C2) f32         folded BN shift, tiled along W
    # w2_ref   : (3*W*C2, W*C2) bf16      banded conv weight (Layer_2)
    # s2_ref   : (1, W*C2) f32
    # b2_ref   : (1, W*C2) f32
    # o_ref    : (1, H, W*C2) f32         gate * concat(x0, x1)
    # pad_ref  : (H+2, W*C2) f32 VMEM scratch, rows 0 and H+1 stay zero (pad)
    H = maps_ref.shape[1]
    L = w1_ref.shape[0]

    maps0 = maps_ref[0]                                   # (H, W*C2)

    # In-kernel zero padding: zero the scratch once, rewrite only the interior.
    pad_ref[...] = jnp.zeros_like(pad_ref)
    pad_ref[pl.ds(1, H), :] = maps0

    def conv(band_bf16):
        # Gather the 3 vertically-shifted row slabs (each lane-dense (H, W*C2))
        # and contract tap+pixel+channel in ONE MXU dot: (H, 3*W*C2)@(3*W*C2, W*C2).
        x = jnp.concatenate(
            [pad_ref[pl.ds(dy, H), :] for dy in range(3)], axis=-1)
        return jnp.dot(x.astype(jnp.bfloat16), band_bf16,
                       preferred_element_type=jnp.float32)        # (H, W*C2) f32

    # Layer_1: hidden conv3x3 + BN + ReLU blocks (intermediate stays in VMEM).
    for l in range(L):
        y = conv(w1_ref[l])
        y = jnp.maximum(y * s1_ref[l] + b1_ref[l], 0.0)
        pad_ref[pl.ds(1, H), :] = y

    # Layer_2: conv3x3 + BN, sigmoid gate, multiply with the original inputs.
    y = conv(w2_ref[...])
    y = y * s2_ref[...] + b2_ref[...]
    gate = pl.reciprocal(1.0 + jnp.exp(-y), approx=True)          # sigmoid
    o_ref[0] = gate * maps0


# ------------------------------ wrapper glue -------------------------------- #

def _band_conv_weight(w_hwio, W):
    """(3,3,Ci,Co) HWIO conv weight -> (3*W*Ci, W*Co) banded matrix.

    Row index = dy*W*Ci + wp*Ci + i (vertical tap, input pixel, in-channel),
    col index = w*Co + o (output pixel, out-channel).  Entry equals
    w_hwio[dy, wp-w+1, i, o] when |wp-w| <= 1, else 0.  Horizontal SAME
    zero-padding is implicit (missing taps contribute zero).
    """
    kh, kw, ci, co = w_hwio.shape
    wp = jnp.arange(W)[None, :, None]
    w = jnp.arange(W)[None, None, :]
    dx = jnp.arange(kw)[:, None, None]
    sel = (wp - w + 1 == dx).astype(w_hwio.dtype)                 # (3, W, W)
    band = jnp.einsum('xpw,yxio->ypiwo', sel, w_hwio)             # (3, W, Ci, W, Co)
    return band.reshape(kh * W * ci, W * co)


def attention_layer_forward(x0, x1, layer1_params, layer2_params):
    """x0, x1: (N, H, W, C) float32 (NHWC).  Returns (gated_x0, gated_x1)."""
    N, H, W, C = x0.shape
    C2 = 2 * C
    WC2 = W * C2
    L = len(layer1_params)

    # torch.cat((x0, x1), channel) with channels flattened onto the lane dim.
    maps0 = jnp.concatenate([x0, x1], axis=-1).reshape(N, H, WC2)

    # Weight / BN prep (tiny, done once in XLA): banded bf16 conv matrices and
    # per-lane (tiled) BN scale/shift so the kernel epilogue is lane-dense.
    w1 = jnp.stack([_band_conv_weight(w, W) for (w, _, _) in layer1_params]
                   ).astype(jnp.bfloat16)                         # (L, 3*WC2, WC2)
    s1 = jnp.stack([jnp.tile(s, W)[None] for (_, s, _) in layer1_params])  # (L,1,WC2)
    b1 = jnp.stack([jnp.tile(b, W)[None] for (_, _, b) in layer1_params])
    w2, s2, b2 = layer2_params
    w2b = _band_conv_weight(w2, W).astype(jnp.bfloat16)           # (3*WC2, WC2)
    s2t = jnp.tile(s2, W)[None]                                   # (1, WC2)
    b2t = jnp.tile(b2, W)[None]

    out = pl.pallas_call(
        _attention_fused_kernel,
        out_shape=jax.ShapeDtypeStruct((N, H, WC2), jnp.float32),
        grid=(N,),
        in_specs=[
            pl.BlockSpec((1, H, WC2), lambda n: (n, 0, 0)),       # maps0 (lane-dense)
            pl.BlockSpec((L, 3 * WC2, WC2), lambda n: (0, 0, 0)), # w1
            pl.BlockSpec((L, 1, WC2), lambda n: (0, 0, 0)),       # s1
            pl.BlockSpec((L, 1, WC2), lambda n: (0, 0, 0)),       # b1
            pl.BlockSpec((3 * WC2, WC2), lambda n: (0, 0)),       # w2
            pl.BlockSpec((1, WC2), lambda n: (0, 0)),             # s2
            pl.BlockSpec((1, WC2), lambda n: (0, 0)),             # b2
        ],
        out_specs=pl.BlockSpec((1, H, WC2), lambda n: (n, 0, 0)),
        scratch_shapes=[pltpu.VMEM((H + 2, WC2), jnp.float32)],
        compiler_params=pltpu.CompilerParams(
            dimension_semantics=("parallel",),          # N shards across v7x TCs
            vmem_limit_bytes=32 * 1024 * 1024),
    )(maps0, w1, s1, b1, w2b, s2t, b2t)

    out = out.reshape(N, H, W, C2)
    return out[..., :C], out[..., C:]


# ------------------------------ reference (XLA) ----------------------------- #

def reference_forward(x0, x1, layer1_params, layer2_params):
    C = x0.shape[-1]
    dn = ("NHWC", "HWIO", "NHWC")
    maps = jnp.concatenate([x0, x1], axis=-1)
    for w, s, b in layer1_params:
        y = lax.conv_general_dilated(
            maps.astype(jnp.bfloat16), w.astype(jnp.bfloat16), (1, 1), "SAME",
            dimension_numbers=dn, preferred_element_type=jnp.float32)
        maps = jnp.maximum(y * s + b, 0.0)
    w2, s2, b2 = layer2_params
    y = lax.conv_general_dilated(
        maps.astype(jnp.bfloat16), w2.astype(jnp.bfloat16), (1, 1), "SAME",
        dimension_numbers=dn, preferred_element_type=jnp.float32)
    gate = jax.nn.sigmoid(y * s2 + b2)
    return gate[..., :C] * x0, gate[..., C:] * x1


# ------------------------------ parameter init ------------------------------ #

def init_params(key, C, hidden_layer_num=1, eps=1e-5):
    C2 = 2 * C

    def bn_fold(k):
        k1, k2, k3, k4 = jax.random.split(k, 4)
        gamma = 1.0 + 0.1 * jax.random.normal(k1, (C2,), jnp.float32)
        beta = 0.1 * jax.random.normal(k2, (C2,), jnp.float32)
        mean = 0.1 * jax.random.normal(k3, (C2,), jnp.float32)
        var = 0.5 + jax.random.uniform(k4, (C2,), dtype=jnp.float32)
        scale = gamma / jnp.sqrt(var + eps)
        shift = beta - mean * scale
        return scale, shift

    keys = jax.random.split(key, 2 * (hidden_layer_num + 1))
    std = (2.0 / (9 * C2)) ** 0.5
    layer1 = []
    for i in range(hidden_layer_num):
        w = std * jax.random.normal(keys[2 * i], (3, 3, C2, C2), jnp.float32)
        s, b = bn_fold(keys[2 * i + 1])
        layer1.append((w, s, b))
    w2 = std * jax.random.normal(keys[-2], (3, 3, C2, C2), jnp.float32)
    s2, b2 = bn_fold(keys[-1])
    return layer1, (w2, s2, b2)


# ----------------------------------- main ----------------------------------- #

if __name__ == "__main__":
    key = jax.random.PRNGKey(0)
    kx0, kx1, kp = jax.random.split(key, 3)

    N, C, H, W = 2, 4, 16, 16        # per-input channels C; convs see 2*C = 8
    x0 = jax.random.normal(kx0, (N, H, W, C), jnp.float32)
    x1 = jax.random.normal(kx1, (N, H, W, C), jnp.float32)
    layer1_params, layer2_params = init_params(kp, C, hidden_layer_num=1)

    fwd = jax.jit(attention_layer_forward)
    out0, out1 = fwd(x0, x1, layer1_params, layer2_params)
    jax.block_until_ready((out0, out1))

    ref0, ref1 = reference_forward(x0, x1, layer1_params, layer2_params)
    assert out0.shape == (N, H, W, C) and out1.shape == (N, H, W, C)
    # Tolerance accounts for bf16 MXU inputs and the approx EUP reciprocal.
    assert jnp.allclose(out0, ref0, atol=1e-2, rtol=1e-2), \
        float(jnp.max(jnp.abs(out0 - ref0)))
    assert jnp.allclose(out1, ref1, atol=1e-2, rtol=1e-2), \
        float(jnp.max(jnp.abs(out1 - ref1)))
    print("KERNEL_OK")
</pallas_src>

<mosaic_0001>
module attributes {stable_mosaic.version = 11 : i64} {
  func.func @_attention_fused_kernel(%arg0: i32, %arg1: memref<1x16x128xf32, #tpu.memory_space<vmem>>, %arg2: memref<1x384x128xbf16, #tpu.memory_space<vmem>>, %arg3: memref<1x1x128xf32, #tpu.memory_space<vmem>>, %arg4: memref<1x1x128xf32, #tpu.memory_space<vmem>>, %arg5: memref<384x128xbf16, #tpu.memory_space<vmem>>, %arg6: memref<1x128xf32, #tpu.memory_space<vmem>>, %arg7: memref<1x128xf32, #tpu.memory_space<vmem>>, %arg8: memref<1x16x128xf32, #tpu.memory_space<vmem>>, %arg9: memref<18x128xf32, #tpu.memory_space<vmem>>) attributes {dimension_semantics = [#tpu.dimension_semantics<parallel>], iteration_bounds = array<i64: 2>, scalar_prefetch = 0 : i64, scratch_operands = 1 : i64, tpu.core_type = #tpu.core_type<tc>, window_params = [{transform_indices = @transform_0, window_bounds = array<i64: 1, 16, 128>}, {pipeline_mode = #tpu.pipeline_mode<synchronous>, transform_indices = @transform_1, window_bounds = array<i64: 1, 384, 128>}, {pipeline_mode = #tpu.pipeline_mode<synchronous>, transform_indices = @transform_2, window_bounds = array<i64: 1, 1, 128>}, {pipeline_mode = #tpu.pipeline_mode<synchronous>, transform_indices = @transform_3, window_bounds = array<i64: 1, 1, 128>}, {pipeline_mode = #tpu.pipeline_mode<synchronous>, transform_indices = @transform_4, window_bounds = array<i64: 384, 128>}, {pipeline_mode = #tpu.pipeline_mode<synchronous>, transform_indices = @transform_5, window_bounds = array<i64: 1, 128>}, {pipeline_mode = #tpu.pipeline_mode<synchronous>, transform_indices = @transform_6, window_bounds = array<i64: 1, 128>}, {transform_indices = @transform_7, window_bounds = array<i64: 1, 16, 128>}]} {
    %c0 = arith.constant 0 : index
    %c0_0 = arith.constant 0 : index
    %c0_1 = arith.constant 0 : index
    %0 = vector.load %arg1[%c0, %c0_0, %c0_1] : memref<1x16x128xf32, #tpu.memory_space<vmem>>, vector<1x16x128xf32>
    %1 = vector.shape_cast %0 : vector<1x16x128xf32> to vector<16x128xf32>
    %cst = arith.constant 0.000000e+00 : f32
    %2 = vector.broadcast %cst : f32 to vector<18x128xf32>
    %c0_2 = arith.constant 0 : index
    %c0_3 = arith.constant 0 : index
    %3 = vector.load %arg9[%c0_2, %c0_3] : memref<18x128xf32, #tpu.memory_space<vmem>>, vector<18x128xf32>
    tpu.vector_store %arg9[%c0_2, %c0_3], %2 {strides = array<i32>} : memref<18x128xf32, #tpu.memory_space<vmem>>, vector<18x128xf32>,
    %c1 = arith.constant 1 : index
    %c0_4 = arith.constant 0 : index
    %4 = vector.load %arg9[%c1, %c0_4] : memref<18x128xf32, #tpu.memory_space<vmem>>, vector<16x128xf32>
    tpu.vector_store %arg9[%c1, %c0_4], %1 {strides = array<i32>} : memref<18x128xf32, #tpu.memory_space<vmem>>, vector<16x128xf32>,
    %c0_5 = arith.constant 0 : index
    %c0_6 = arith.constant 0 : index
    %c0_7 = arith.constant 0 : index
    %5 = vector.load %arg2[%c0_5, %c0_6, %c0_7] : memref<1x384x128xbf16, #tpu.memory_space<vmem>>, vector<1x384x128xbf16>
    %6 = vector.shape_cast %5 : vector<1x384x128xbf16> to vector<384x128xbf16>
    %c0_8 = arith.constant 0 : index
    %c0_9 = arith.constant 0 : index
    %7 = vector.load %arg9[%c0_8, %c0_9] : memref<18x128xf32, #tpu.memory_space<vmem>>, vector<16x128xf32>
    %c1_10 = arith.constant 1 : index
    %c0_11 = arith.constant 0 : index
    %8 = vector.load %arg9[%c1_10, %c0_11] : memref<18x128xf32, #tpu.memory_space<vmem>>, vector<16x128xf32>
    %c2 = arith.constant 2 : index
    %c0_12 = arith.constant 0 : index
    %9 = vector.load %arg9[%c2, %c0_12] : memref<18x128xf32, #tpu.memory_space<vmem>>, vector<16x128xf32>
    %10 = tpu.concatenate %7, %8, %9 in 1 : vector<16x128xf32>, vector<16x128xf32>, vector<16x128xf32> -> vector<16x384xf32>
    %11 = arith.truncf %10 : vector<16x384xf32> to vector<16x384xbf16>
    %cst_13 = arith.constant dense<0.000000e+00> : vector<16x128xf32>
    %12 = tpu.matmul %11, %6, %cst_13 {dimension_numbers = #tpu.dot_dimension_numbers<[1], [0], [0], [1], [0, 0, 1, 1], [], []>} : vector<16x384xbf16>, vector<384x128xbf16>, vector<16x128xf32> -> vector<16x128xf32>
    %c0_14 = arith.constant 0 : index
    %c0_15 = arith.constant 0 : index
    %c0_16 = arith.constant 0 : index
    %13 = vector.load %arg3[%c0_14, %c0_15, %c0_16] : memref<1x1x128xf32, #tpu.memory_space<vmem>>, vector<1x1x128xf32>
    %14 = vector.shape_cast %13 : vector<1x1x128xf32> to vector<1x128xf32>
    %15 = vector.broadcast %14 : vector<1x128xf32> to vector<16x128xf32>
    %16 = arith.mulf %12, %15 : vector<16x128xf32>
    %c0_17 = arith.constant 0 : index
    %c0_18 = arith.constant 0 : index
    %c0_19 = arith.constant 0 : index
    %17 = vector.load %arg4[%c0_17, %c0_18, %c0_19] : memref<1x1x128xf32, #tpu.memory_space<vmem>>, vector<1x1x128xf32>
    %18 = vector.shape_cast %17 : vector<1x1x128xf32> to vector<1x128xf32>
    %19 = vector.broadcast %18 : vector<1x128xf32> to vector<16x128xf32>
    %20 = arith.addf %16, %19 : vector<16x128xf32>
    %cst_20 = arith.constant 0.000000e+00 : f32
    %21 = vector.broadcast %cst_20 : f32 to vector<16x128xf32>
    %22 = arith.maximumf %20, %21 : vector<16x128xf32>
    %c1_21 = arith.constant 1 : index
    %c0_22 = arith.constant 0 : index
    %23 = vector.load %arg9[%c1_21, %c0_22] : memref<18x128xf32, #tpu.memory_space<vmem>>, vector<16x128xf32>
    tpu.vector_store %arg9[%c1_21, %c0_22], %22 {strides = array<i32>} : memref<18x128xf32, #tpu.memory_space<vmem>>, vector<16x128xf32>,
    %c0_23 = arith.constant 0 : index
    %c0_24 = arith.constant 0 : index
    %24 = vector.load %arg5[%c0_23, %c0_24] : memref<384x128xbf16, #tpu.memory_space<vmem>>, vector<384x128xbf16>
    %c0_25 = arith.constant 0 : index
    %c0_26 = arith.constant 0 : index
    %25 = vector.load %arg9[%c0_25, %c0_26] : memref<18x128xf32, #tpu.memory_space<vmem>>, vector<16x128xf32>
    %c1_27 = arith.constant 1 : index
    %c0_28 = arith.constant 0 : index
    %26 = vector.load %arg9[%c1_27, %c0_28] : memref<18x128xf32, #tpu.memory_space<vmem>>, vector<16x128xf32>
    %c2_29 = arith.constant 2 : index
    %c0_30 = arith.constant 0 : index
    %27 = vector.load %arg9[%c2_29, %c0_30] : memref<18x128xf32, #tpu.memory_space<vmem>>, vector<16x128xf32>
    %28 = tpu.concatenate %25, %26, %27 in 1 : vector<16x128xf32>, vector<16x128xf32>, vector<16x128xf32> -> vector<16x384xf32>
    %29 = arith.truncf %28 : vector<16x384xf32> to vector<16x384xbf16>
    %cst_31 = arith.constant dense<0.000000e+00> : vector<16x128xf32>
    %30 = tpu.matmul %29, %24, %cst_31 {dimension_numbers = #tpu.dot_dimension_numbers<[1], [0], [0], [1], [0, 0, 1, 1], [], []>} : vector<16x384xbf16>, vector<384x128xbf16>, vector<16x128xf32> -> vector<16x128xf32>
    %c0_32 = arith.constant 0 : index
    %c0_33 = arith.constant 0 : index
    %31 = vector.load %arg6[%c0_32, %c0_33] : memref<1x128xf32, #tpu.memory_space<vmem>>, vector<1x128xf32>
    %32 = vector.broadcast %31 : vector<1x128xf32> to vector<16x128xf32>
    %33 = arith.mulf %30, %32 : vector<16x128xf32>
    %c0_34 = arith.constant 0 : index
    %c0_35 = arith.constant 0 : index
    %34 = vector.load %arg7[%c0_34, %c0_35] : memref<1x128xf32, #tpu.memory_space<vmem>>, vector<1x128xf32>
    %35 = vector.broadcast %34 : vector<1x128xf32> to vector<16x128xf32>
    %36 = arith.addf %33, %35 : vector<16x128xf32>
    %cst_36 = arith.constant 0.000000e+00 : f32
    %37 = vector.broadcast %cst_36 : f32 to vector<16x128xf32>
    %38 = arith.subf %37, %36 : vector<16x128xf32>
    %39 = math.exp %38 : vector<16x128xf32>
    %cst_37 = arith.constant 1.000000e+00 : f32
    %40 = vector.broadcast %cst_37 : f32 to vector<16x128xf32>
    %41 = arith.addf %40, %39 : vector<16x128xf32>
    %42 = tpu.reciprocal %41 {approx = true} : vector<16x128xf32> -> vector<16x128xf32>
    %43 = arith.mulf %42, %1 : vector<16x128xf32>
    %c0_38 = arith.constant 0 : index
    %c0_39 = arith.constant 0 : index
    %c0_40 = arith.constant 0 : index
    %44 = vector.load %arg8[%c0_38, %c0_39, %c0_40] : memref<1x16x128xf32, #tpu.memory_space<vmem>>, vector<1x16x128xf32>
    %45 = vector.shape_cast %44 : vector<1x16x128xf32> to vector<16x128xf32>
    %46 = vector.shape_cast %43 : vector<16x128xf32> to vector<1x16x128xf32>
    tpu.vector_store %arg8[%c0_38, %c0_39, %c0_40], %46 {strides = array<i32>} : memref<1x16x128xf32, #tpu.memory_space<vmem>>, vector<1x16x128xf32>,
    return
  }
  func.func @transform_0(%arg0: i32) -> (i32, i32, i32) {
    %c0_i32 = arith.constant 0 : i32
    %c0_i32_0 = arith.constant 0 : i32
    %c0_i32_1 = arith.constant 0 : i32
    return %arg0, %c0_i32, %c0_i32_0 : i32, i32, i32
  }
  func.func @transform_1(%arg0: i32) -> (i32, i32, i32) {
    %c0_i32 = arith.constant 0 : i32
    %c0_i32_0 = arith.constant 0 : i32
    %c0_i32_1 = arith.constant 0 : i32
    %c0_i32_2 = arith.constant 0 : i32
    return %c0_i32, %c0_i32_0, %c0_i32_1 : i32, i32, i32
  }
  func.func @transform_2(%arg0: i32) -> (i32, i32, i32) {
    %c0_i32 = arith.constant 0 : i32
    %c0_i32_0 = arith.constant 0 : i32
    %c0_i32_1 = arith.constant 0 : i32
    %c0_i32_2 = arith.constant 0 : i32
    return %c0_i32, %c0_i32_0, %c0_i32_1 : i32, i32, i32
  }
  func.func @transform_3(%arg0: i32) -> (i32, i32, i32) {
    %c0_i32 = arith.constant 0 : i32
    %c0_i32_0 = arith.constant 0 : i32
    %c0_i32_1 = arith.constant 0 : i32
    %c0_i32_2 = arith.constant 0 : i32
    return %c0_i32, %c0_i32_0, %c0_i32_1 : i32, i32, i32
  }
  func.func @transform_4(%arg0: i32) -> (i32, i32) {
    %c0_i32 = arith.constant 0 : i32
    %c0_i32_0 = arith.constant 0 : i32
    %c0_i32_1 = arith.constant 0 : i32
    return %c0_i32, %c0_i32_0 : i32, i32
  }
  func.func @transform_5(%arg0: i32) -> (i32, i32) {
    %c0_i32 = arith.constant 0 : i32
    %c0_i32_0 = arith.constant 0 : i32
    %c0_i32_1 = arith.constant 0 : i32
    return %c0_i32, %c0_i32_0 : i32, i32
  }
  func.func @transform_6(%arg0: i32) -> (i32, i32) {
    %c0_i32 = arith.constant 0 : i32
    %c0_i32_0 = arith.constant 0 : i32
    %c0_i32_1 = arith.constant 0 : i32
    return %c0_i32, %c0_i32_0 : i32, i32
  }
  func.func @transform_7(%arg0: i32) -> (i32, i32, i32) {
    %c0_i32 = arith.constant 0 : i32
    %c0_i32_0 = arith.constant 0 : i32
    %c0_i32_1 = arith.constant 0 : i32
    return %arg0, %c0_i32, %c0_i32_0 : i32, i32, i32
  }
}

</mosaic_0001>

<bundles_post_ra>
// kernel: tile.23
= control target key start
LH: loop header
LB: loop body
LE: loop exit
PB: predicated region body
PF: predicated region fallthrough
CT: control target
= control target key end

     0   :  { %s28_s0 = inlined_call_operand.vmem [shape: f32[8], index: 0, kind: input, shape index: {}]   ;;  %s29_s1 = inlined_call_operand.vmem [shape: f32[16,8], index: 1, kind: output, shape index: {}]  }
   0x1   :  { %v4_v0 = vld [vmem:[%s28_s0] ss:$0 sm:$0xff] }
   0x2   :  { %5 = vst [vmem:[%s29_s1] sm:$0xff] %v4_v0  ;;  %8 = vst [vmem:[%s29_s1 + $0x8] sm:$0xff] %v4_v0 }

// kernel: tile.24
= control target key start
LH: loop header
LB: loop body
LE: loop exit
PB: predicated region body
PF: predicated region fallthrough
CT: control target
= control target key end

     0   :  { %s131_s10 = smov 120   ;;  %s132_s11 = smov 104   ;;  %vm3_vm0 = vcmask 64512   ;;  %vm9_vm1 = vcmask 1048512   ;;  %vm15_vm2 = vcmask 982912   ;;  %vm21_vm3 = vcmask 917312   ;;  %s207_s0 = inlined_call_operand.vmem [shape: f32[16,8], index: 0, kind: input, shape index: {}]   ;;  %s208_s1 = inlined_call_operand.vmem [shape: f32[1,1,128], index: 1, kind: output, shape index: {}]  }
   0x1   :  { %v101_v0 = vld [vmem:[%s207_s0 + $0xf] sm:$0x1]   ;;  %v103_v1 = vld [vmem:[%s207_s0 + $0xd] sm:$0x1]   ;;  %v102_v2 = vld [vmem:[%s207_s0 + $0xe] sm:$0x1]  }
   0x2   :  { %7 = vrot.lane.b32.xlu0 %v101_v0, %s131_s10  ;;  %19 = vrot.lane.b32.xlu1 %v103_v1, %s132_s11  ;;  %v104_v3 = vld [vmem:[%s207_s0 + $0xc] sm:$0x1]   ;;  %s133_s16 = smov 112   ;;  %s134_s17 = smov 96   ;;  %v105_v4 = vld [vmem:[%s207_s0 + $0xb] sm:$0x1]  }
   0x3   :  { %v106_v5 = vld [vmem:[%s207_s0 + $0xa] sm:$0x1]   ;;  %v2_v6 = vld [vmem:[%s207_s0] sm:$0x1]   ;;  %s135_s24 = smov 88   ;;  %s136_s25 = smov 80  }
   0x4   :  { %4 = vst.msk [vmem:[#allocation0] sm:$0x1] %vm3_vm0, %v2_v6   ;;  %v107_v7 = vld [vmem:[%s207_s0 + $0x9] sm:$0x1]   ;;  %v108_v8 = vld [vmem:[%s207_s0 + $0x8] sm:$0x1]  }
   0x5   :  { %s137_s30 = smov 72   ;;  %s138_s2 = smov 64   ;;  %v109_v9 = vld [vmem:[%s207_s0 + $0x7] sm:$0x1]   ;;  %v110_v10 = vld [vmem:[%s207_s0 + $0x6] sm:$0x1]  }
   0x6   :  { %13 = vrot.lane.b32.xlu0 %v102_v2, %s133_s16  ;;  %25 = vrot.lane.b32.xlu1 %v104_v3, %s134_s17  ;;  %s139_s7 = smov 56   ;;  %s140_s8 = smov 48   ;;  %v111_v11 = vld [vmem:[%s207_s0 + $0x5] sm:$0x1]   ;;  %v112_v12 = vld [vmem:[%s207_s0 + $0x4] sm:$0x1]  }
   0x7   :  { %s141_s13 = smov 40   ;;  %s142_s14 = smov 32   ;;  %v113_v13 = vld [vmem:[%s207_s0 + $0x3] sm:$0x1]   ;;  %v114_v14 = vld [vmem:[%s207_s0 + $0x2] sm:$0x1]  }
   0x8   :  { %s143_s19 = smov 24   ;;  %s144_s20 = smov 16   ;;  %v115_v15 = vld [vmem:[%s207_s0 + $0x1] sm:$0x1]   ;;  %vm27_vm4 = vcmask 851712   ;;  %vm33_vm5 = vcmask 786112  }
   0x9   :  { %s145_s0 = smov 8   ;;  %vm39_vm6 = vcmask 720512   ;;  %vm45_vm7 = vcmask 654912   ;;  %vm51_vm8 = vcmask 589312   ;;  %vm57_vm9 = vcmask 523712  }
   0xa   :  { %31 = vrot.lane.b32.xlu0 %v105_v4, %s135_s24  ;;  %37 = vrot.lane.b32.xlu1 %v106_v5, %s136_s25  ;;  %vm63_vm10 = vcmask 458112   ;;  %vm69_vm11 = vcmask 392512   ;;  %vm75_vm12 = vcmask 326912   ;;  %vm81_vm13 = vcmask 261312  }
   0xb   :  { %vm87_vm14 = vcmask 195712   ;;  %vm93_vm15 = vcmask 130112  }
   0xe   :  { %43 = vrot.lane.b32.xlu0 %v107_v7, %s137_s30  ;;  %49 = vrot.lane.b32.xlu1 %v108_v8, %s138_s2 }
  0x12   :  { %55 = vrot.lane.b32.xlu0 %v109_v9, %s139_s7  ;;  %61 = vrot.lane.b32.xlu1 %v110_v10, %s140_s8 }
  0x16   :  { %67 = vrot.lane.b32.xlu0 %v111_v11, %s141_s13  ;;  %73 = vrot.lane.b32.xlu1 %v112_v12, %s142_s14 }
  0x1a   :  { %79 = vrot.lane.b32.xlu0 %v113_v13, %s143_s19  ;;  %85 = vrot.lane.b32.xlu1 %v114_v14, %s144_s20 }
  0x1e   :  { %91 = vrot.lane.b32.xlu0 %v115_v15, %s145_s0 }
  0x74   :  { %v8_v16 = vpop.permute.xlu0 %7   ;;  %v20_v17 = vpop.permute.xlu1 %19  }
  0x75   :  { %10 = vst.msk [vmem:[#allocation0] sm:$0x1] %vm9_vm1, %v8_v16  }
  0x78   :  { %v14_v18 = vpop.permute.xlu0 %13   ;;  %v26_v19 = vpop.permute.xlu1 %25  }
  0x79   :  { %16 = vst.msk [vmem:[#allocation0] sm:$0x1] %vm15_vm2, %v14_v18  }
  0x7a   :  { %22 = vst.msk [vmem:[#allocation0] sm:$0x1] %vm21_vm3, %v20_v17  }
  0x7b   :  { %28 = vst.msk [vmem:[#allocation0] sm:$0x1] %vm27_vm4, %v26_v19  }
  0x7c   :  { %v32_v20 = vpop.permute.xlu0 %31   ;;  %v38_v21 = vpop.permute.xlu1 %37  }
  0x7d   :  { %34 = vst.msk [vmem:[#allocation0] sm:$0x1] %vm33_vm5, %v32_v20  }
  0x7e   :  { %40 = vst.msk [vmem:[#allocation0] sm:$0x1] %vm39_vm6, %v38_v21  }
  0x80   :  { %v44_v22 = vpop.permute.xlu0 %43   ;;  %v50_v23 = vpop.permute.xlu1 %49  }
  0x81   :  { %46 = vst.msk [vmem:[#allocation0] sm:$0x1] %vm45_vm7, %v44_v22  }
  0x82   :  { %52 = vst.msk [vmem:[#allocation0] sm:$0x1] %vm51_vm8, %v50_v23  }
  0x84   :  { %v56_v24 = vpop.permute.xlu0 %55   ;;  %v62_v25 = vpop.permute.xlu1 %61  }
  0x85   :  { %58 = vst.msk [vmem:[#allocation0] sm:$0x1] %vm57_vm9, %v56_v24  }
  0x86   :  { %64 = vst.msk [vmem:[#allocation0] sm:$0x1] %vm63_vm10, %v62_v25  }
  0x88   :  { %v68_v26 = vpop.permute.xlu0 %67   ;;  %v74_v27 = vpop.permute.xlu1 %73  }
  0x89   :  { %70 = vst.msk [vmem:[#allocation0] sm:$0x1] %vm69_vm11, %v68_v26  }
  0x8a   :  { %76 = vst.msk [vmem:[#allocation0] sm:$0x1] %vm75_vm12, %v74_v27  }
  0x8c   :  { %v80_v28 = vpop.permute.xlu0 %79   ;;  %v86_v29 = vpop.permute.xlu1 %85  }
  0x8d   :  { %82 = vst.msk [vmem:[#allocation0] sm:$0x1] %vm81_vm13, %v80_v28  }
  0x8e   :  { %88 = vst.msk [vmem:[#allocation0] sm:$0x1] %vm87_vm14, %v86_v29  }
  0x90   :  { %v92_v30 = vpop.permute.xlu0 %91  }
  0x91   :  { %94 = vst.msk [vmem:[#allocation0] sm:$0x1] %vm93_vm15, %v92_v30  }
  0x98   :  { %v98_v31 = vld [vmem:[#allocation0] sm:$0x1] }
  0x99   :  { %100 = vst [vmem:[%s208_s1] sm:$0x1] %v98_v31 }

// kernel: tile.34
= control target key start
LH: loop header
LB: loop body
LE: loop exit
PB: predicated region body
PF: predicated region fallthrough
CT: control target
= control target key end

     0   :  { %s131_s10 = smov 120   ;;  %s132_s11 = smov 104   ;;  %vm3_vm0 = vcmask 64512   ;;  %vm9_vm1 = vcmask 1048512   ;;  %vm15_vm2 = vcmask 982912   ;;  %vm21_vm3 = vcmask 917312   ;;  %s207_s0 = inlined_call_operand.vmem [shape: f32[16,8], index: 0, kind: input, shape index: {}]   ;;  %s208_s1 = inlined_call_operand.vmem [shape: f32[1,128], index: 1, kind: output, shape index: {}]  }
   0x1   :  { %v101_v0 = vld [vmem:[%s207_s0 + $0xf] sm:$0x1]   ;;  %v103_v1 = vld [vmem:[%s207_s0 + $0xd] sm:$0x1]   ;;  %v102_v2 = vld [vmem:[%s207_s0 + $0xe] sm:$0x1]  }
   0x2   :  { %7 = vrot.lane.b32.xlu0 %v101_v0, %s131_s10  ;;  %19 = vrot.lane.b32.xlu1 %v103_v1, %s132_s11  ;;  %v104_v3 = vld [vmem:[%s207_s0 + $0xc] sm:$0x1]   ;;  %s133_s16 = smov 112   ;;  %s134_s17 = smov 96   ;;  %v105_v4 = vld [vmem:[%s207_s0 + $0xb] sm:$0x1]  }
   0x3   :  { %v106_v5 = vld [vmem:[%s207_s0 + $0xa] sm:$0x1]   ;;  %v2_v6 = vld [vmem:[%s207_s0] sm:$0x1]   ;;  %s135_s24 = smov 88   ;;  %s136_s25 = smov 80  }
   0x4   :  { %4 = vst.msk [vmem:[#allocation0] sm:$0x1] %vm3_vm0, %v2_v6   ;;  %v107_v7 = vld [vmem:[%s207_s0 + $0x9] sm:$0x1]   ;;  %v108_v8 = vld [vmem:[%s207_s0 + $0x8] sm:$0x1]  }
   0x5   :  { %s137_s30 = smov 72   ;;  %s138_s2 = smov 64   ;;  %v109_v9 = vld [vmem:[%s207_s0 + $0x7] sm:$0x1]   ;;  %v110_v10 = vld [vmem:[%s207_s0 + $0x6] sm:$0x1]  }
   0x6   :  { %13 = vrot.lane.b32.xlu0 %v102_v2, %s133_s16  ;;  %25 = vrot.lane.b32.xlu1 %v104_v3, %s134_s17  ;;  %s139_s7 = smov 56   ;;  %s140_s8 = smov 48   ;;  %v111_v11 = vld [vmem:[%s207_s0 + $0x5] sm:$0x1]   ;;  %v112_v12 = vld [vmem:[%s207_s0 + $0x4] sm:$0x1]  }
   0x7   :  { %s141_s13 = smov 40   ;;  %s142_s14 = smov 32   ;;  %v113_v13 = vld [vmem:[%s207_s0 + $0x3] sm:$0x1]   ;;  %v114_v14 = vld [vmem:[%s207_s0 + $0x2] sm:$0x1]  }
   0x8   :  { %s143_s19 = smov 24   ;;  %s144_s20 = smov 16   ;;  %v115_v15 = vld [vmem:[%s207_s0 + $0x1] sm:$0x1]   ;;  %vm27_vm4 = vcmask 851712   ;;  %vm33_vm5 = vcmask 786112  }
   0x9   :  { %s145_s0 = smov 8   ;;  %vm39_vm6 = vcmask 720512   ;;  %vm45_vm7 = vcmask 654912   ;;  %vm51_vm8 = vcmask 589312   ;;  %vm57_vm9 = vcmask 523712  }
   0xa   :  { %31 = vrot.lane.b32.xlu0 %v105_v4, %s135_s24  ;;  %37 = vrot.lane.b32.xlu1 %v106_v5, %s136_s25  ;;  %vm63_vm10 = vcmask 458112   ;;  %vm69_vm11 = vcmask 392512   ;;  %vm75_vm12 = vcmask 326912   ;;  %vm81_vm13 = vcmask 261312  }
   0xb   :  { %vm87_vm14 = vcmask 195712   ;;  %vm93_vm15 = vcmask 130112  }
   0xe   :  { %43 = vrot.lane.b32.xlu0 %v107_v7, %s137_s30  ;;  %49 = vrot.lane.b32.xlu1 %v108_v8, %s138_s2 }
  0x12   :  { %55 = vrot.lane.b32.xlu0 %v109_v9, %s139_s7  ;;  %61 = vrot.lane.b32.xlu1 %v110_v10, %s140_s8 }
  0x16   :  { %67 = vrot.lane.b32.xlu0 %v111_v11, %s141_s13  ;;  %73 = vrot.lane.b32.xlu1 %v112_v12, %s142_s14 }
  0x1a   :  { %79 = vrot.lane.b32.xlu0 %v113_v13, %s143_s19  ;;  %85 = vrot.lane.b32.xlu1 %v114_v14, %s144_s20 }
  0x1e   :  { %91 = vrot.lane.b32.xlu0 %v115_v15, %s145_s0 }
  0x74   :  { %v8_v16 = vpop.permute.xlu0 %7   ;;  %v20_v17 = vpop.permute.xlu1 %19  }
  0x75   :  { %10 = vst.msk [vmem:[#allocation0] sm:$0x1] %vm9_vm1, %v8_v16  }
  0x78   :  { %v14_v18 = vpop.permute.xlu0 %13   ;;  %v26_v19 = vpop.permute.xlu1 %25  }
  0x79   :  { %16 = vst.msk [vmem:[#allocation0] sm:$0x1] %vm15_vm2, %v14_v18  }
  0x7a   :  { %22 = vst.msk [vmem:[#allocation0] sm:$0x1] %vm21_vm3, %v20_v17  }
  0x7b   :  { %28 = vst.msk [vmem:[#allocation0] sm:$0x1] %vm27_vm4, %v26_v19  }
  0x7c   :  { %v32_v20 = vpop.permute.xlu0 %31   ;;  %v38_v21 = vpop.permute.xlu1 %37  }
  0x7d   :  { %34 = vst.msk [vmem:[#allocation0] sm:$0x1] %vm33_vm5, %v32_v20  }
  0x7e   :  { %40 = vst.msk [vmem:[#allocation0] sm:$0x1] %vm39_vm6, %v38_v21  }
  0x80   :  { %v44_v22 = vpop.permute.xlu0 %43   ;;  %v50_v23 = vpop.permute.xlu1 %49  }
  0x81   :  { %46 = vst.msk [vmem:[#allocation0] sm:$0x1] %vm45_vm7, %v44_v22  }
  0x82   :  { %52 = vst.msk [vmem:[#allocation0] sm:$0x1] %vm51_vm8, %v50_v23  }
  0x84   :  { %v56_v24 = vpop.permute.xlu0 %55   ;;  %v62_v25 = vpop.permute.xlu1 %61  }
  0x85   :  { %58 = vst.msk [vmem:[#allocation0] sm:$0x1] %vm57_vm9, %v56_v24  }
  0x86   :  { %64 = vst.msk [vmem:[#allocation0] sm:$0x1] %vm63_vm10, %v62_v25  }
  0x88   :  { %v68_v26 = vpop.permute.xlu0 %67   ;;  %v74_v27 = vpop.permute.xlu1 %73  }
  0x89   :  { %70 = vst.msk [vmem:[#allocation0] sm:$0x1] %vm69_vm11, %v68_v26  }
  0x8a   :  { %76 = vst.msk [vmem:[#allocation0] sm:$0x1] %vm75_vm12, %v74_v27  }
  0x8c   :  { %v80_v28 = vpop.permute.xlu0 %79   ;;  %v86_v29 = vpop.permute.xlu1 %85  }
  0x8d   :  { %82 = vst.msk [vmem:[#allocation0] sm:$0x1] %vm81_vm13, %v80_v28  }
  0x8e   :  { %88 = vst.msk [vmem:[#allocation0] sm:$0x1] %vm87_vm14, %v86_v29  }
  0x90   :  { %v92_v30 = vpop.permute.xlu0 %91  }
  0x91   :  { %94 = vst.msk [vmem:[#allocation0] sm:$0x1] %vm93_vm15, %v92_v30  }
  0x98   :  { %v98_v31 = vld [vmem:[#allocation0] sm:$0x1] }
  0x99   :  { %100 = vst [vmem:[%s208_s1] sm:$0x1] %v98_v31 }

// kernel: attention_layer_forward.1
= control target key start
LH: loop header
LB: loop body
LE: loop exit
PB: predicated region body
PF: predicated region fallthrough
CT: control target
= control target key end

     0   :  { %s1245_s24 = smov 0   ;;  %s1462_s0 = inlined_call_operand.vmem [shape: f32[2,16,128], index: 0, kind: input, shape index: {}]   ;;  %s1463_s1 = inlined_call_operand.vmem [shape: bf16[1,384,128], index: 1, kind: input, shape index: {}]   ;;  %s1464_s2 = inlined_call_operand.vmem [shape: f32[1,1,128], index: 2, kind: input, shape index: {}]   ;;  %s1465_s3 = inlined_call_operand.vmem [shape: f32[1,1,128], index: 3, kind: input, shape index: {}]   ;;  %s1466_s4 = inlined_call_operand.vmem [shape: bf16[384,128], index: 4, kind: input, shape index: {}]   ;;  %s1467_s5 = inlined_call_operand.vmem [shape: f32[1,128], index: 5, kind: input, shape index: {}]   ;;  %s1468_s6 = inlined_call_operand.vmem [shape: f32[1,128], index: 6, kind: input, shape index: {}]   ;;  %s1469_s7 = inlined_call_operand.vmem [shape: f32[2,16,128], index: 7, kind: output, shape index: {}]  }
   0x1 LB: > { %s962_s25 = sadd.s32 4294967295, %s1201_s24   ;;  %p966_p0 = scmp.ge.s32.totalorder %s1201_s24, 1  ;;  %s1201_s24 = sphi %s1245_s24, %s17_s24  }
   0x2   : > { %p237_p1 = scmp.lt.s32.totalorder %s1201_s24, 3 }
   0x4   : > { %p238_p2 = pnand %p966_p0, %p237_p1 }
   0x5   : > { %v1139_v0 = vld [vmem:[%s1463_s1 + $0x40] sm:$0xff] (!%p238_p2)   ;;  %v1203_v1 = vmov (!%p238_p2), 0.0   ;;  %v1142_v4 = vld [vmem:[%s1463_s1 + $0x48] sm:$0xff] (!%p238_p2)   ;;  %vm1204_vm0 = vmmov (!%p238_p2), 0   ;;  %v1145_v7 = vld [vmem:[%s1463_s1 + $0x50] sm:$0xff] (!%p238_p2)   ;;  %p269_p3 = scmp.lt.s32.totalorder (!%p238_p2), %s962_s25, 1 }
   0x6   : > { %241 = sbr.rel (%p238_p2) target bundleno = 528 (0x210), region = 48  ;;  %1089 = vmatprep.subr.bf16.mxu1 (!%p238_p2), %v1203_v1  ;;  %282 = vst [vmem:[#allocation2] sm:$0xff] (!%p238_p2), %v1203_v1  ;;  %283 = vst [vmem:[#allocation2 + $0x8] sm:$0xff] (!%p238_p2), %v1203_v1  ;;  %v1140_v2 = vld [vmem:[%s1463_s1] sm:$0xff] (!%p238_p2)   ;;  %1027 = vmatprep.subr.bf16.mxu0 (!%p238_p2), %v1139_v0  ;;  %v1143_v5 = vld [vmem:[%s1463_s1 + $0x8] sm:$0xff] (!%p238_p2)  }
   0x7   : > { %284 = vst [vmem:[#allocation2 + $0x10] sm:$0x3] (!%p238_p2), %v1203_v1  ;;  %v1141_v3 = vld [vmem:[%s1463_s1 + $0x80] sm:$0xff] (!%p238_p2)   ;;  %1028 = vmatpush3.bf16.msra.mxu0 (!%p238_p2), %v1140_v2  ;;  %1105 = vmatprep.mubr.msk.bf16.mxu1 (!%p238_p2), %vm1204_vm0, %v1203_v1  ;;  %v1144_v6 = vld [vmem:[%s1463_s1 + $0x88] sm:$0xff] (!%p238_p2)   ;;  %v1146_v8 = vld [vmem:[%s1463_s1 + $0x10] sm:$0xff] (!%p238_p2)  }
   0x8   : > { %1090 = vmatpush3.bf16.msra.mxu1 (!%p238_p2), %v1141_v3  ;;  %1029 = vmatprep.subr.bf16.mxu0 (!%p238_p2), %v1142_v4  ;;  %v1147_v9 = vld [vmem:[%s1463_s1 + $0x90] sm:$0xff] (!%p238_p2)   ;;  %v1148_v10 = vld [vmem:[%s1463_s1 + $0x58] sm:$0xff] (!%p238_p2)   ;;  %v1151_v13 = vld [vmem:[%s1463_s1 + $0x60] sm:$0xff] (!%p238_p2)  }
   0x9   : > { %1091 = vmatprep.subr.bf16.mxu1 (!%p238_p2), %v1203_v1  ;;  %v1149_v11 = vld [vmem:[%s1463_s1 + $0x18] sm:$0xff] (!%p238_p2)   ;;  %v1152_v14 = vld [vmem:[%s1463_s1 + $0x20] sm:$0xff] (!%p238_p2)   ;;  %v1154_v16 = vld [vmem:[%s1463_s1 + $0x68] sm:$0xff] (!%p238_p2)  }
   0xa   : > { %v1150_v12 = vld [vmem:[%s1463_s1 + $0x98] sm:$0xff] (!%p238_p2)   ;;  %v1153_v15 = vld [vmem:[%s1463_s1 + $0xa0] sm:$0xff] (!%p238_p2)   ;;  %v1155_v17 = vld [vmem:[%s1463_s1 + $0x28] sm:$0xff] (!%p238_p2)  }
   0xb   : > { %1030 = vmatpush3.bf16.msra.mxu0 (!%p238_p2), %v1143_v5  ;;  %v1156_v18 = vld [vmem:[%s1463_s1 + $0xa8] sm:$0xff] (!%p238_p2)   ;;  %v1157_v19 = vld [vmem:[%s1463_s1 + $0x70] sm:$0xff] (!%p238_p2)   ;;  %v1160_v22 = vld [vmem:[%s1463_s1 + $0x78] sm:$0xff] (!%p238_p2)  }
   0xc   : > { %1092 = vmatpush3.bf16.msra.mxu1 (!%p238_p2), %v1144_v6  ;;  %1031 = vmatprep.subr.bf16.mxu0 (!%p238_p2), %v1145_v7  ;;  %v1158_v20 = vld [vmem:[%s1463_s1 + $0x30] sm:$0xff] (!%p238_p2)   ;;  %v1161_v26 = vld [vmem:[%s1463_s1 + $0x38] sm:$0xff] (!%p238_p2)   ;;  %v1163_v28 = vld [vmem:[%s1466_s4 + $0x40] sm:$0xff] (!%p238_p2)  }
   0xd   : > { %1093 = vmatprep.subr.bf16.mxu1 %v1203_v1  ;;  %s1471_s25 = smov (!%p269_p3, %s962_s25), 1  ;;  %v1159_v21 = vld [vmem:[%s1463_s1 + $0xb0] sm:$0xff]   ;;  %v1162_v27 = vld [vmem:[%s1463_s1 + $0xb8] sm:$0xff]   ;;  %v1165_v29 = vld [vmem:[%s1466_s4] sm:$0xff]  }
   0xe   : > { %s1025_s16 = sshll.u32 %s1471_s25, 4  ;;  %v1164_v30 = vld [vmem:[%s1466_s4 + $0x80] sm:$0xff]   ;;  %v1166_v31 = vld [vmem:[%s1466_s4 + $0x48] sm:$0xff]   ;;  %v1169_v40 = vld [vmem:[%s1466_s4 + $0x50] sm:$0xff]  }
   0xf   : > { %1032 = vmatpush3.bf16.msra.mxu0 %v1146_v8  ;;  %s273_s27 = scalar_lea.vmem %s1462_s0, %s1025_s16  ;;  %v1168_v38 = vld [vmem:[%s1466_s4 + $0x8] sm:$0xff]   ;;  %v1170_v41 = vld [vmem:[%s1466_s4 + $0x90] sm:$0xff]   ;;  %v1172_v43 = vld [vmem:[%s1466_s4 + $0x58] sm:$0xff]   ;;  %s278_s11 = scalar_lea.vmem %s1469_s7, %s1025_s16 }
  0x10   : > { %1094 = vmatpush3.bf16.msra.mxu1 %v1147_v9  ;;  %1033 = vmatprep.subr.bf16.mxu0 %v1148_v10  ;;  %v1342_v23 = vld [vmem:[%s273_s27] sm:$0xff]  ;;  %v1344_v24 = vld [vmem:[%s273_s27 + $0x8] sm:$0xff]  ;;  %v1171_v42 = vld [vmem:[%s1466_s4 + $0x10] sm:$0xff]  }
  0x11   : > { %1095 = vmatprep.subr.bf16.mxu1 %v1203_v1  ;;  %285 = vst [vmem:[#allocation2 + $0x1] sm:$0xff] %v1342_v23  ;;  %286 = vst [vmem:[#allocation2 + $0x9] sm:$0xff] %v1344_v24  ;;  %v342_v25 = vpack.c.bf16 %v1344_v24, %v1342_v23  ;;  %v1167_v39 = vld [vmem:[%s1466_s4 + $0x88] sm:$0xff]   ;;  %v1173_v44 = vld [vmem:[%s1466_s4 + $0x98] sm:$0xff]  }
  0x12   : > { %v1174_v45 = vld [vmem:[%s1466_s4 + $0x18] sm:$0xff]   ;;  %v1175_v46 = vld [vmem:[%s1466_s4 + $0x60] sm:$0xff]   ;;  %v1178_v49 = vld [vmem:[%s1466_s4 + $0x68] sm:$0xff]  }
  0x13   : > { %1034 = vmatpush3.bf16.msra.mxu0 %v1149_v11  ;;  %520 = vmatprep.mubr.bf16.mxu0 %v342_v25  ;;  %v1176_v47 = vld [vmem:[%s1466_s4 + $0xa0] sm:$0xff]   ;;  %v1179_v50 = vld [vmem:[%s1466_s4 + $0xa8] sm:$0xff]   ;;  %v1181_v52 = vld [vmem:[%s1466_s4 + $0x70] sm:$0xff]  }
  0x14   : > { %1096 = vmatpush3.bf16.msra.mxu1 %v1150_v12  ;;  %1035 = vmatprep.subr.bf16.mxu0 %v1151_v13  ;;  %v1177_v48 = vld [vmem:[%s1466_s4 + $0x20] sm:$0xff]   ;;  %v1180_v51 = vld [vmem:[%s1466_s4 + $0x28] sm:$0xff]   ;;  %v1182_v53 = vld [vmem:[%s1466_s4 + $0xb0] sm:$0xff]  }
  0x15   : > { %1097 = vmatprep.subr.bf16.mxu1 %v1203_v1  ;;  %v1183_v54 = vld [vmem:[%s1466_s4 + $0x30] sm:$0xff]   ;;  %v1184_v55 = vld [vmem:[%s1466_s4 + $0x78] sm:$0xff]   ;;  %v995_v0 = vld [vmem:[%s1464_s2] ss:$0 sm:$0xff] }
  0x16   : > { %v1185_v56 = vld [vmem:[%s1466_s4 + $0xb8] sm:$0xff]  }
  0x17   : > { %1036 = vmatpush3.bf16.msra.mxu0 %v1152_v14  ;;  %v1186_v57 = vld [vmem:[%s1466_s4 + $0x38] sm:$0xff]  }
  0x18   : > { %1098 = vmatpush3.bf16.msra.mxu1 %v1153_v15  ;;  %1037 = vmatprep.subr.bf16.mxu0 %v1154_v16  ;;  %v335_v32 = vld [vmem:[#allocation2] sm:$0xff]  ;;  %v336_v33 = vld [vmem:[#allocation2 + $0x8] sm:$0xff] }
  0x19   : > { %1099 = vmatprep.subr.bf16.mxu1 %v1203_v1  ;;  %v339_v34 = vld [vmem:[#allocation2 + $0x2] sm:$0xff]  ;;  %v341_v35 = vpack.c.bf16 %v336_v33, %v335_v32  ;;  %v340_v36 = vld [vmem:[#allocation2 + $0xa] sm:$0xff] }
  0x1a   : > { %v343_v37 = vpack.c.bf16 %v340_v36, %v339_v34 }
  0x1b   : > { %1038 = vmatpush3.bf16.msra.mxu0 %v1155_v17 }
  0x1c   : > { %1100 = vmatpush3.bf16.msra.mxu1 %v1156_v18  ;;  %1039 = vmatprep.subr.bf16.mxu0 %v1157_v19 }
  0x1d   : > { %1101 = vmatprep.subr.bf16.mxu1 %v1203_v1 }
  0x1f   : > { %1040 = vmatpush3.bf16.msra.mxu0 %v1158_v20 }
  0x20   : > { %1102 = vmatpush3.bf16.msra.mxu1 %v1159_v21  ;;  %1041 = vmatprep.subr.bf16.mxu0 %v1160_v22 }
  0x21   : > { %1103 = vmatprep.subr.bf16.mxu1 %v1203_v1 }
  0x23   : > { %1042 = vmatpush3.bf16.msra.mxu0 %v1161_v26 }
  0x24   : > { %1104 = vmatpush3.bf16.msra.mxu1 %v1162_v27  ;;  %1058 = vmatprep.subr.bf16.mxu0 %v1163_v28 }
  0x25   : > { %1109 = vmatprep.subr.bf16.mxu1 %v1203_v1 }
  0x26   : > { %521 = vmatmul.mubr.bf16.vlgmr.msra.gmra.mrb[0].mxu0 %v341_v35  ;;  %v1022_v35 = vld [vmem:[%s1468_s6] ss:$0 sm:$0xff] }
  0x27   : > { %1106 = vmatmul.mubr.bf16.vlgmr.msra.gmra.mrb[0].mxu1 %v343_v37  ;;  %1059 = vmatpush3.bf16.msra.mxu0 %v1165_v29 }
  0x28   : > { %1110 = vmatpush3.bf16.msra.mxu1 %v1164_v30  ;;  %1060 = vmatprep.subr.bf16.mxu0 %v1166_v31  ;;  %v1021_v30 = vld [vmem:[%s1467_s5] ss:$0 sm:$0xff] }
  0x29   : > { %1111 = vmatprep.subr.bf16.mxu1 %v1203_v1  ;;  %1125 = vmatprep.mubr.msk.bf16.mxu1 %vm1204_vm0, %v1203_v1 }
  0x2b   : > { %1061 = vmatpush3.bf16.msra.mxu0 %v1168_v38 }
  0x2c   : > { %1112 = vmatpush3.bf16.msra.mxu1 %v1167_v39  ;;  %1062 = vmatprep.subr.bf16.mxu0 %v1169_v40 }
  0x2d   : > { %1113 = vmatprep.subr.bf16.mxu1 %v1203_v1 }
  0x2f   : > { %1063 = vmatpush3.bf16.msra.mxu0 %v1171_v42 }
  0x30   : > { %1114 = vmatpush3.bf16.msra.mxu1 %v1170_v41  ;;  %1064 = vmatprep.subr.bf16.mxu0 %v1172_v43 }
  0x31   : > { %1115 = vmatprep.subr.bf16.mxu1 %v1203_v1 }
  0x33   : > { %1065 = vmatpush3.bf16.msra.mxu0 %v1174_v45 }
  0x34   : > { %1116 = vmatpush3.bf16.msra.mxu1 %v1173_v44  ;;  %1066 = vmatprep.subr.bf16.mxu0 %v1175_v46 }
  0x35   : > { %1117 = vmatprep.subr.bf16.mxu1 %v1203_v1 }
  0x37   : > { %1067 = vmatpush3.bf16.msra.mxu0 %v1177_v48 }
  0x38   : > { %1118 = vmatpush3.bf16.msra.mxu1 %v1176_v47  ;;  %1068 = vmatprep.subr.bf16.mxu0 %v1178_v49 }
  0x39   : > { %1119 = vmatprep.subr.bf16.mxu1 %v1203_v1 }
  0x3b   : > { %1069 = vmatpush3.bf16.msra.mxu0 %v1180_v51 }
  0x3c   : > { %1120 = vmatpush3.bf16.msra.mxu1 %v1179_v50  ;;  %1070 = vmatprep.subr.bf16.mxu0 %v1181_v52 }
  0x3d   : > { %1121 = vmatprep.subr.bf16.mxu1 %v1203_v1 }
  0x3f   : > { %1071 = vmatpush3.bf16.msra.mxu0 %v1183_v54 }
  0x40   : > { %1122 = vmatpush3.bf16.msra.mxu1 %v1182_v53  ;;  %1072 = vmatprep.subr.bf16.mxu0 %v1184_v55 }
  0x41   : > { %1123 = vmatprep.subr.bf16.mxu1 %v1203_v1  ;;  %v996_v1 = vld [vmem:[%s1465_s3] ss:$0 sm:$0xff] }
  0x43   : > { %1073 = vmatpush3.bf16.msra.mxu0 %v1186_v57 }
  0x44   : > { %1124 = vmatpush3.bf16.msra.mxu1 %v1185_v56 }
  0xf9   : > { %v1043_v58 = vpop.f32.mrb[0].mxu0 }
  0xfa   : > { %v563_v59 = vpop.f32.mrb[0].mxu1  ;;  %v1044_v60 = vpop.f32.mrb[1].mxu0 }
  0xfb   : > { %v1045_v61 = vadd.f32 %v1044_v60, %v1043_v58  ;;  %v1107_v62 = vpop.f32.mrb[1].mxu1  ;;  %v1046_v63 = vpop.f32.mrb[2].mxu0 }
  0xfc   : > { %v566_v2 = vpop.f32.mrb[2].mxu1  ;;  %v1047_v3 = vpop.f32.mrb[3].mxu0 }
  0xfd   : > { %v564_v4 = vadd.f32 %v1045_v61, %v563_v59  ;;  %v1048_v5 = vadd.f32 %v1047_v3, %v1046_v63  ;;  %v1108_v6 = vpop.f32.mrb[3].mxu1 }
  0xff   : > { %v577_v7 = vmul.f32 %v995_v0, %v564_v4  ;;  %v567_v8 = vadd.f32 %v1048_v5, %v566_v2 }
 0x101   : > { %v586_v9 = vadd.f32 %v996_v1, %v577_v7  ;;  %v578_v10 = vmul.f32 %v995_v0, %v567_v8 }
 0x103   : > { %v588_v11 = vmax.f32 %v586_v9, 0.0  ;;  %v587_v12 = vadd.f32 %v996_v1, %v578_v10 }
 0x105   : > { %590 = vst [vmem:[#allocation2 + $0x1] sm:$0xff] %v588_v11  ;;  %v589_v13 = vmax.f32 %v587_v12, 0.0 }
 0x107   : > { %591 = vst [vmem:[#allocation2 + $0x9] sm:$0xff] %v589_v13  ;;  %v647_v14 = vpack.c.bf16 %v589_v13, %v588_v11 }
 0x109   : > { %825 = vmatprep.mubr.bf16.mxu0 %v647_v14 }
 0x10c   : > { %v640_v15 = vld [vmem:[#allocation2] sm:$0xff] }
 0x10e   : > { %v644_v16 = vld [vmem:[#allocation2 + $0x2] sm:$0xff]  ;;  %v645_v17 = vld [vmem:[#allocation2 + $0xa] sm:$0xff] }
 0x10f   : > { %v641_v18 = vld [vmem:[#allocation2 + $0x8] sm:$0xff]  ;;  %v648_v19 = vpack.c.bf16 %v645_v17, %v644_v16 }
 0x110   : > { %v646_v20 = vpack.c.bf16 %v641_v18, %v640_v15 }
 0x111   : > { %1126 = vmatmul.mubr.bf16.vlgmr.msra.gmra.mrb[4].mxu1 %v648_v19 }
 0x112   : > { %826 = vmatmul.mubr.bf16.vlgmr.msra.gmra.mrb[4].mxu0 %v646_v20 }
 0x1e4   : > { %v868_v21 = vpop.f32.mrb[4].mxu1 }
 0x1e5   : > { %v1074_v22 = vpop.f32.mrb[4].mxu0  ;;  %v1127_v25 = vpop.f32.mrb[5].mxu1 }
 0x1e6   : > { %v1075_v26 = vpop.f32.mrb[5].mxu0  ;;  %v871_v28 = vpop.f32.mrb[6].mxu1 }
 0x1e7   : > { %v1076_v27 = vadd.f32 %v1075_v26, %v1074_v22  ;;  %v1077_v29 = vpop.f32.mrb[6].mxu0  ;;  %v1128_v31 = vpop.f32.mrb[7].mxu1 }
 0x1e8   : > { %v1078_v32 = vpop.f32.mrb[7].mxu0 }
 0x1e9   : > { %v869_v33 = vadd.f32 %v1076_v27, %v868_v21  ;;  %v1079_v34 = vadd.f32 %v1078_v32, %v1077_v29 }
 0x1eb   : > { %v882_v36 = vmul.f32 %v1021_v30, %v869_v33  ;;  %v872_v37 = vadd.f32 %v1079_v34, %v871_v28 }
 0x1ed   : > { %v891_v38 = vadd.f32 %v1022_v35, %v882_v36  ;;  %v883_v39 = vmul.f32 %v1021_v30, %v872_v37 }
 0x1ef   : > { %v893_v40 = vsub.f32 0.0, %v891_v38  ;;  %v892_v41 = vadd.f32 %v1022_v35, %v883_v39 }
 0x1f1   : > { %v895_v42 = vmul.f32 1.442695, %v893_v40  ;;  %v894_v43 = vsub.f32 0.0, %v892_v41 }
 0x1f3   : > { %1187 = vpow2.f32 %v895_v42  ;;  %v897_v44 = vmul.f32 1.442695, %v894_v43 }
 0x1f5   : > { %1189 = vpow2.f32 %v897_v44 }
 0x1fd   : > { %v1188_v45 = vpop.eup %1187 }
 0x1fe   : > { %v899_v46 = vadd.f32 1.0, %v1188_v45 }
 0x1ff   : > { %v1190_v47 = vpop.eup %1189 }
 0x200   : > { %1191 = vrcp.f32 %v899_v46  ;;  %v900_v48 = vadd.f32 1.0, %v1190_v47 }
 0x202   : > { %1193 = vrcp.f32 %v900_v48 }
 0x20a   : > { %v1192_v49 = vpop.eup %1191 }
 0x20b   : > { %v903_v50 = vmul.f32 %v1192_v49, %v1342_v23 }
 0x20c   : > { %v1194_v51 = vpop.eup %1193 }
 0x20d   : > { %905 = vst [vmem:[%s278_s11] sm:$0xff] %v903_v50  ;;  %v904_v52 = vmul.f32 %v1194_v51, %v1344_v24 }
 0x20f   : > { %906 = vst [vmem:[%s278_s11 + $0x8] sm:$0xff] %v904_v52 }
 0x210 PF: > { %s17_s24 = sadd.s32 1, %s1201_s24  }
 0x211   : > { %p14_p4 = scmp.ge.s32.totalorder %s17_s24, 4  }
 0x213   :  { %16 = sbr.rel (!%p14_p4) target bundleno = 1 (0x1), region = 78 }

</bundles_post_ra>
